<compile_context>
chip_gen: v7x
topology: tpu7x:2x2x1
jax: 0.10.0
libtpu: 0.0.40
codegen_flags: <defaults>
</compile_context>

<pallas_src>
import functools
import math
from typing import Any, NamedTuple, Tuple

import jax
import jax.numpy as jnp
from jax.experimental import pallas as pl
from jax.experimental.pallas import tpu as pltpu

_LANE = 128      # lane width: last block dim multiple
_SUBLANE = 8     # f32 sublane width: second-to-last block dim multiple
_FALLBACK_VMEM_LIMIT = 48 * 1024 * 1024


def _round_up(x, m):
    return (x + m - 1) // m * m


@functools.lru_cache(maxsize=None)
def _vmem_limit_bytes():
    """Generation-aware VMEM budget (~80% of physical VMEM)."""
    try:
        info = pltpu.get_tpu_info()
        cap = getattr(info, "vmem_capacity_bytes", None)
        if cap:
            return int(0.8 * cap)
    except Exception:
        pass
    return _FALLBACK_VMEM_LIMIT


# ----------------------------------------------------------------------------
# Parameter preparation: pad + cast once, reuse every forward.
# ----------------------------------------------------------------------------
class PreparedParams(NamedTuple):
    dims: Tuple[int, ...]        # logical [in, h0, ..., out]
    dims_pad: Tuple[int, ...]    # lane-dense padded dims
    layers: Tuple[Tuple[jax.Array, jax.Array], ...]   # ((W_pad, b_pad), ...)
    compute_dtype: Any           # MXU operand dtype (bf16 fast path by default)


def prepare_silu_mlp_params(params, compute_dtype=jnp.bfloat16):
    """params: list of (W [in,out], b [1,out] or [out]) in f32."""
    dims = [params[0][0].shape[0]] + [w.shape[1] for w, _ in params]
    dims_pad = [_round_up(d, _LANE) for d in dims]
    layers = []
    for l, (w, b) in enumerate(params):
        d_in, d_out = w.shape
        w_p = jnp.zeros((dims_pad[l], dims_pad[l + 1]), dtype=compute_dtype)
        w_p = w_p.at[:d_in, :d_out].set(w.astype(compute_dtype))
        b_p = jnp.zeros((1, dims_pad[l + 1]), dtype=jnp.float32)
        b_p = b_p.at[:, :d_out].set(b.reshape(1, -1).astype(jnp.float32))
        layers.append((w_p, b_p))
    return PreparedParams(tuple(dims), tuple(dims_pad), tuple(layers), compute_dtype)


# ----------------------------------------------------------------------------
# Fused whole-MLP kernel (weights resident in VMEM, grid over batch tiles only)
# ----------------------------------------------------------------------------
def _fused_mlp_kernel(*refs, num_layers, compute_dtype):
    # refs = (x_ref, w0, b0, w1, b1, ..., w_{L-1}, b_{L-1}, o_ref)
    x_ref = refs[0]
    o_ref = refs[-1]
    h = x_ref[...].astype(compute_dtype)
    for layer in range(num_layers):
        w_ref = refs[1 + 2 * layer]
        b_ref = refs[2 + 2 * layer]
        y = jnp.dot(h, w_ref[...], preferred_element_type=jnp.float32)   # MXU, f32 acc
        y = y + b_ref[...]                                               # (1, N) f32 bias
        if layer < num_layers - 1:
            y = y * jax.nn.sigmoid(y)                                    # SiLU (EUP + VPU)
            h = y.astype(compute_dtype)                                  # feed next MXU op
        else:
            h = y
    o_ref[...] = h.astype(o_ref.dtype)


def _choose_tm(batch, dims_pad):
    b_pad = _round_up(batch, _SUBLANE)
    # >= 2 batch tiles whenever possible: v7x has 2 TensorCores per chip.
    tm = min(256, _round_up(-(-b_pad // 2), _SUBLANE))
    # Bound vreg/spill pressure with wide hidden layers (also protects v5e's
    # single vector-store slot).
    if max(dims_pad) >= 512:
        tm = min(tm, 128)
    return max(tm, _SUBLANE)


def _fused_vmem_estimate(dims_pad, tm, weight_itemsize):
    """VMEM footprint estimate (bytes) for the fused kernel."""
    n = len(dims_pad) - 1
    # resident weights counted once (single-buffered), f32 biases
    wb = sum(dims_pad[l] * dims_pad[l + 1] * weight_itemsize
             + _SUBLANE * dims_pad[l + 1] * 4 for l in range(n))
    io = 2 * tm * (dims_pad[0] * weight_itemsize + dims_pad[-1] * 4)  # dbl-buffered x/out
    act = 2 * tm * max(dims_pad) * 4                                  # f32 activation slack
    return wb + io + act


def fused_silu_mlp(x, prepped: PreparedParams, *, tm=None):
    """Run the full MLP in a single pallas_call. x: [B, In] -> [B, Out]."""
    dims, dims_pad, layers, cdt = (prepped.dims, prepped.dims_pad,
                                   prepped.layers, prepped.compute_dtype)
    num_layers = len(layers)
    B, in_dim = x.shape
    assert in_dim == dims[0]

    if tm is None:
        tm = _choose_tm(B, dims_pad)
    tm = _round_up(min(tm, _round_up(B, _SUBLANE)), _SUBLANE)
    B_pad = _round_up(B, tm)

    x_p = jnp.zeros((B_pad, dims_pad[0]), dtype=cdt).at[:B, :in_dim].set(x.astype(cdt))
    operands = [x_p]
    for w_p, b_p in layers:
        operands += [w_p, b_p]

    def run(single_buffer_weights):
        # Constant block index -> weights/biases stay resident across all batch
        # tiles; Buffered(1) removes the (useless) second buffer.
        wkw = {"pipeline_mode": pl.Buffered(1)} if single_buffer_weights else {}
        in_specs = [pl.BlockSpec((tm, dims_pad[0]), lambda i: (i, 0))]
        for l in range(num_layers):
            in_specs.append(
                pl.BlockSpec((dims_pad[l], dims_pad[l + 1]), lambda i: (0, 0), **wkw))
            in_specs.append(
                pl.BlockSpec((1, dims_pad[l + 1]), lambda i: (0, 0), **wkw))
        return pl.pallas_call(
            functools.partial(_fused_mlp_kernel, num_layers=num_layers,
                              compute_dtype=cdt),
            out_shape=jax.ShapeDtypeStruct((B_pad, dims_pad[-1]), x.dtype),
            grid_spec=pltpu.PrefetchScalarGridSpec(
                num_scalar_prefetch=0,
                grid=(B_pad // tm,),
                in_specs=in_specs,
                out_specs=pl.BlockSpec((tm, dims_pad[-1]), lambda i: (i, 0)),
            ),
            compiler_params=pltpu.CompilerParams(
                dimension_semantics=("parallel",),
                vmem_limit_bytes=_vmem_limit_bytes(),
            ),
        )(*operands)

    try:
        out_p = run(True)
    except Exception:
        out_p = run(False)   # pipeline_mode unsupported -> default double buffering
    return out_p[:B, :dims[-1]]


# ----------------------------------------------------------------------------
# Fallback: per-layer (i, j, k)-tiled linear (+ optional SiLU) for large layers
# ----------------------------------------------------------------------------
def _tiled_linear_kernel(x_ref, w_ref, b_ref, o_ref, acc_ref, *, apply_silu):
    k = pl.program_id(2)

    @pl.when(k == 0)
    def _():
        acc_ref[...] = jnp.zeros_like(acc_ref)

    acc_ref[...] += jnp.dot(x_ref[...], w_ref[...],
                            preferred_element_type=jnp.float32)

    @pl.when(k == pl.num_programs(2) - 1)
    def _():
        y = acc_ref[...] + b_ref[...].astype(jnp.float32)
        if apply_silu:
            y = y * jax.nn.sigmoid(y)
        o_ref[...] = y.astype(o_ref.dtype)


def _pick_feature_tile(dim_pad, pref):
    """Largest multiple of 128 <= pref that divides dim_pad."""
    t = max(min(pref, dim_pad) // _LANE * _LANE, _LANE)
    while dim_pad % t:
        t -= _LANE
    return t


def _tiled_linear_padded(x_p, w_p, b_p, *, apply_silu, out_dtype, tm, tn, tk):
    """x_p: [Bp, Inp] (Bp % tm == 0), w_p: [Inp, Outp], b_p: [1, Outp] (padded)."""
    Bp, Inp = x_p.shape
    Inp2, Outp = w_p.shape
    assert Inp == Inp2 and Bp % tm == 0
    tn = _pick_feature_tile(Outp, tn)
    tk = _pick_feature_tile(Inp, tk)
    return pl.pallas_call(
        functools.partial(_tiled_linear_kernel, apply_silu=apply_silu),
        out_shape=jax.ShapeDtypeStruct((Bp, Outp), out_dtype),
        grid_spec=pltpu.PrefetchScalarGridSpec(
            num_scalar_prefetch=0,
            grid=(Bp // tm, Outp // tn, Inp // tk),          # reduction axis last
            in_specs=[
                pl.BlockSpec((tm, tk), lambda i, j, k: (i, k)),
                pl.BlockSpec((tk, tn), lambda i, j, k: (k, j)),
                pl.BlockSpec((1, tn), lambda i, j, k: (0, j)),
            ],
            out_specs=pl.BlockSpec((tm, tn), lambda i, j, k: (i, j)),
            scratch_shapes=[pltpu.VMEM((tm, tn), jnp.float32)],
        ),
        compiler_params=pltpu.CompilerParams(
            dimension_semantics=("parallel", "parallel", "arbitrary"),
            vmem_limit_bytes=_vmem_limit_bytes(),
        ),
    )(x_p, w_p, b_p)


def tiled_silu_mlp(x, prepped: PreparedParams, *, tm=256, tn=256, tk=512):
    """Chain of tiled matmuls on padded activations (input padded once)."""
    dims, dims_pad, layers, cdt = (prepped.dims, prepped.dims_pad,
                                   prepped.layers, prepped.compute_dtype)
    B, in_dim = x.shape
    assert in_dim == dims[0]
    tm = _round_up(min(tm, _round_up(B, _SUBLANE)), _SUBLANE)
    B_pad = _round_up(B, tm)
    h = jnp.zeros((B_pad, dims_pad[0]), dtype=cdt).at[:B, :in_dim].set(x.astype(cdt))
    n = len(layers)
    for l, (w_p, b_p) in enumerate(layers):
        last = l == n - 1
        h = _tiled_linear_padded(h, w_p, b_p, apply_silu=not last,
                                 out_dtype=(x.dtype if last else cdt),
                                 tm=tm, tn=tn, tk=tk)
    return h[:B, :dims[-1]]


# ----------------------------------------------------------------------------
# Module-level API (matches SiluMLP.forward / init_weights)
# ----------------------------------------------------------------------------
def init_silu_mlp_params(key, input_dim, hidden_dims, output_dim, dtype=jnp.float32):
    """kaiming_uniform_(nonlinearity='relu') weights, zero biases; stored as
    W: [in, out] (transpose of PyTorch's [out, in]), b: [1, out]."""
    dims = [input_dim] + list(hidden_dims) + [output_dim]
    params = []
    for d_in, d_out in zip(dims[:-1], dims[1:]):
        key, sub = jax.random.split(key)
        bound = math.sqrt(6.0 / d_in)     # gain sqrt(2) * sqrt(3/fan_in)
        w = jax.random.uniform(sub, (d_in, d_out), dtype=dtype,
                               minval=-bound, maxval=bound)
        b = jnp.zeros((1, d_out), dtype=dtype)
        params.append((w, b))
    return params


def silu_mlp_forward(x, prepped: PreparedParams, *, tm=None):
    """SiLU after every layer except the last; fused kernel when weights fit
    resident in VMEM, per-layer tiled matmuls otherwise."""
    dims_pad = prepped.dims_pad
    if tm is None:
        tm = _choose_tm(x.shape[0], dims_pad)
    w_itemsize = jnp.dtype(prepped.compute_dtype).itemsize
    est = _fused_vmem_estimate(dims_pad, tm, w_itemsize)
    if est <= int(0.85 * _vmem_limit_bytes()):
        return fused_silu_mlp(x, prepped, tm=tm)
    # Middle path (activations resident, weights streamed via pltpu.emit_pipeline)
    # would remove the per-layer activation HBM round trips; using the tiled
    # chain on padded activations for now.
    return tiled_silu_mlp(x, prepped)


def _reference_forward(x, params):
    n = len(params)
    h = x
    for i, (w, b) in enumerate(params):
        h = jnp.dot(h, w, precision=jax.lax.Precision.HIGHEST) + b
        if i < n - 1:
            h = h * jax.nn.sigmoid(h)
    return h


if __name__ == "__main__":
    key = jax.random.PRNGKey(0)
    kx, kp, kx2, kp2 = jax.random.split(key, 4)

    # Small demo consistent with the module: 32 -> [64, 64] -> 8, batch 8.
    batch, input_dim, hidden_dims, output_dim = 8, 32, [64, 64], 8
    x = jax.random.normal(kx, (batch, input_dim), dtype=jnp.float32)
    params = init_silu_mlp_params(kp, input_dim, hidden_dims, output_dim)
    ref = _reference_forward(x, params)

    # 1) f32 compute path through the fused, weight-resident kernel.
    prepped_f32 = prepare_silu_mlp_params(params, compute_dtype=jnp.float32)
    out_f32 = jax.block_until_ready(silu_mlp_forward(x, prepped_f32))
    assert out_f32.shape == (batch, output_dim)
    assert jnp.allclose(out_f32, ref, atol=2e-3, rtol=2e-3)

    # 2) bf16 MXU fast path (default) through the same fused kernel.
    prepped_bf16 = prepare_silu_mlp_params(params)     # compute_dtype=bf16
    out_bf16 = jax.block_until_ready(silu_mlp_forward(x, prepped_bf16))
    assert out_bf16.shape == (batch, output_dim)
    assert jnp.allclose(out_bf16, ref, atol=1e-1, rtol=1e-1)

    # 3) Explicitly exercise the (i, j, k)-tiled fallback path.
    x2 = jax.random.normal(kx2, (256, 256), dtype=jnp.float32)
    params2 = init_silu_mlp_params(kp2, 256, [384], 128)
    prepped2 = prepare_silu_mlp_params(params2, compute_dtype=jnp.float32)
    out2 = jax.block_until_ready(tiled_silu_mlp(x2, prepped2))
    ref2 = _reference_forward(x2, params2)
    assert out2.shape == (256, 128)
    assert jnp.allclose(out2, ref2, atol=3e-3, rtol=3e-3)

    print("KERNEL_OK")
</pallas_src>

<mosaic_0001>
module attributes {stable_mosaic.version = 11 : i64} {
  func.func @_fused_mlp_kernel(%arg0: i32, %arg1: memref<8x128xf32, #tpu.memory_space<vmem>>, %arg2: memref<128x128xf32, #tpu.memory_space<vmem>>, %arg3: memref<1x128xf32, #tpu.memory_space<vmem>>, %arg4: memref<128x128xf32, #tpu.memory_space<vmem>>, %arg5: memref<1x128xf32, #tpu.memory_space<vmem>>, %arg6: memref<128x128xf32, #tpu.memory_space<vmem>>, %arg7: memref<1x128xf32, #tpu.memory_space<vmem>>, %arg8: memref<8x128xf32, #tpu.memory_space<vmem>>) attributes {dimension_semantics = [#tpu.dimension_semantics<parallel>], iteration_bounds = array<i64: 1>, scalar_prefetch = 0 : i64, scratch_operands = 0 : i64, tpu.core_type = #tpu.core_type<tc>, window_params = [{transform_indices = @transform_0, window_bounds = array<i64: 8, 128>}, {pipeline_mode = #tpu.pipeline_mode<synchronous>, transform_indices = @transform_1, window_bounds = array<i64: 128, 128>}, {pipeline_mode = #tpu.pipeline_mode<synchronous>, transform_indices = @transform_2, window_bounds = array<i64: 1, 128>}, {pipeline_mode = #tpu.pipeline_mode<synchronous>, transform_indices = @transform_3, window_bounds = array<i64: 128, 128>}, {pipeline_mode = #tpu.pipeline_mode<synchronous>, transform_indices = @transform_4, window_bounds = array<i64: 1, 128>}, {pipeline_mode = #tpu.pipeline_mode<synchronous>, transform_indices = @transform_5, window_bounds = array<i64: 128, 128>}, {pipeline_mode = #tpu.pipeline_mode<synchronous>, transform_indices = @transform_6, window_bounds = array<i64: 1, 128>}, {transform_indices = @transform_7, window_bounds = array<i64: 8, 128>}]} {
    %c0 = arith.constant 0 : index
    %c0_0 = arith.constant 0 : index
    %0 = vector.load %arg1[%c0, %c0_0] : memref<8x128xf32, #tpu.memory_space<vmem>>, vector<8x128xf32>
    %c0_1 = arith.constant 0 : index
    %c0_2 = arith.constant 0 : index
    %1 = vector.load %arg2[%c0_1, %c0_2] : memref<128x128xf32, #tpu.memory_space<vmem>>, vector<128x128xf32>
    %cst = arith.constant dense<0.000000e+00> : vector<8x128xf32>
    %2 = tpu.matmul %0, %1, %cst {dimension_numbers = #tpu.dot_dimension_numbers<[1], [0], [0], [1], [0, 0, 1, 1], [], []>} : vector<8x128xf32>, vector<128x128xf32>, vector<8x128xf32> -> vector<8x128xf32>
    %c0_3 = arith.constant 0 : index
    %c0_4 = arith.constant 0 : index
    %3 = vector.load %arg3[%c0_3, %c0_4] : memref<1x128xf32, #tpu.memory_space<vmem>>, vector<1x128xf32>
    %4 = vector.broadcast %3 : vector<1x128xf32> to vector<8x128xf32>
    %5 = arith.addf %2, %4 : vector<8x128xf32>
    %6 = arith.negf %5 : vector<8x128xf32>
    %7 = math.exp %6 : vector<8x128xf32>
    %cst_5 = arith.constant 1.000000e+00 : f32
    %8 = vector.broadcast %cst_5 : f32 to vector<8x128xf32>
    %9 = arith.addf %8, %7 : vector<8x128xf32>
    %10 = arith.divf %8, %9 : vector<8x128xf32>
    %11 = arith.mulf %5, %10 : vector<8x128xf32>
    %c0_6 = arith.constant 0 : index
    %c0_7 = arith.constant 0 : index
    %12 = vector.load %arg4[%c0_6, %c0_7] : memref<128x128xf32, #tpu.memory_space<vmem>>, vector<128x128xf32>
    %cst_8 = arith.constant dense<0.000000e+00> : vector<8x128xf32>
    %13 = tpu.matmul %11, %12, %cst_8 {dimension_numbers = #tpu.dot_dimension_numbers<[1], [0], [0], [1], [0, 0, 1, 1], [], []>} : vector<8x128xf32>, vector<128x128xf32>, vector<8x128xf32> -> vector<8x128xf32>
    %c0_9 = arith.constant 0 : index
    %c0_10 = arith.constant 0 : index
    %14 = vector.load %arg5[%c0_9, %c0_10] : memref<1x128xf32, #tpu.memory_space<vmem>>, vector<1x128xf32>
    %15 = vector.broadcast %14 : vector<1x128xf32> to vector<8x128xf32>
    %16 = arith.addf %13, %15 : vector<8x128xf32>
    %17 = arith.negf %16 : vector<8x128xf32>
    %18 = math.exp %17 : vector<8x128xf32>
    %cst_11 = arith.constant 1.000000e+00 : f32
    %19 = vector.broadcast %cst_11 : f32 to vector<8x128xf32>
    %20 = arith.addf %19, %18 : vector<8x128xf32>
    %21 = arith.divf %19, %20 : vector<8x128xf32>
    %22 = arith.mulf %16, %21 : vector<8x128xf32>
    %c0_12 = arith.constant 0 : index
    %c0_13 = arith.constant 0 : index
    %23 = vector.load %arg6[%c0_12, %c0_13] : memref<128x128xf32, #tpu.memory_space<vmem>>, vector<128x128xf32>
    %cst_14 = arith.constant dense<0.000000e+00> : vector<8x128xf32>
    %24 = tpu.matmul %22, %23, %cst_14 {dimension_numbers = #tpu.dot_dimension_numbers<[1], [0], [0], [1], [0, 0, 1, 1], [], []>} : vector<8x128xf32>, vector<128x128xf32>, vector<8x128xf32> -> vector<8x128xf32>
    %c0_15 = arith.constant 0 : index
    %c0_16 = arith.constant 0 : index
    %25 = vector.load %arg7[%c0_15, %c0_16] : memref<1x128xf32, #tpu.memory_space<vmem>>, vector<1x128xf32>
    %26 = vector.broadcast %25 : vector<1x128xf32> to vector<8x128xf32>
    %27 = arith.addf %24, %26 : vector<8x128xf32>
    %c0_17 = arith.constant 0 : index
    %c0_18 = arith.constant 0 : index
    %28 = vector.load %arg8[%c0_17, %c0_18] : memref<8x128xf32, #tpu.memory_space<vmem>>, vector<8x128xf32>
    tpu.vector_store %arg8[%c0_17, %c0_18], %27 {strides = array<i32>} : memref<8x128xf32, #tpu.memory_space<vmem>>, vector<8x128xf32>,
    return
  }
  func.func @transform_0(%arg0: i32) -> (i32, i32) {
    %c0_i32 = arith.constant 0 : i32
    %c0_i32_0 = arith.constant 0 : i32
    return %arg0, %c0_i32 : i32, i32
  }
  func.func @transform_1(%arg0: i32) -> (i32, i32) {
    %c0_i32 = arith.constant 0 : i32
    %c0_i32_0 = arith.constant 0 : i32
    %c0_i32_1 = arith.constant 0 : i32
    return %c0_i32, %c0_i32_0 : i32, i32
  }
  func.func @transform_2(%arg0: i32) -> (i32, i32) {
    %c0_i32 = arith.constant 0 : i32
    %c0_i32_0 = arith.constant 0 : i32
    %c0_i32_1 = arith.constant 0 : i32
    return %c0_i32, %c0_i32_0 : i32, i32
  }
  func.func @transform_3(%arg0: i32) -> (i32, i32) {
    %c0_i32 = arith.constant 0 : i32
    %c0_i32_0 = arith.constant 0 : i32
    %c0_i32_1 = arith.constant 0 : i32
    return %c0_i32, %c0_i32_0 : i32, i32
  }
  func.func @transform_4(%arg0: i32) -> (i32, i32) {
    %c0_i32 = arith.constant 0 : i32
    %c0_i32_0 = arith.constant 0 : i32
    %c0_i32_1 = arith.constant 0 : i32
    return %c0_i32, %c0_i32_0 : i32, i32
  }
  func.func @transform_5(%arg0: i32) -> (i32, i32) {
    %c0_i32 = arith.constant 0 : i32
    %c0_i32_0 = arith.constant 0 : i32
    %c0_i32_1 = arith.constant 0 : i32
    return %c0_i32, %c0_i32_0 : i32, i32
  }
  func.func @transform_6(%arg0: i32) -> (i32, i32) {
    %c0_i32 = arith.constant 0 : i32
    %c0_i32_0 = arith.constant 0 : i32
    %c0_i32_1 = arith.constant 0 : i32
    return %c0_i32, %c0_i32_0 : i32, i32
  }
  func.func @transform_7(%arg0: i32) -> (i32, i32) {
    %c0_i32 = arith.constant 0 : i32
    %c0_i32_0 = arith.constant 0 : i32
    return %arg0, %c0_i32 : i32, i32
  }
}

module attributes {stable_mosaic.version = 11 : i64} {
  func.func @_fused_mlp_kernel(%arg0: i32, %arg1: memref<8x128xf32, #tpu.memory_space<vmem>>, %arg2: memref<128x128xf32, #tpu.memory_space<vmem>>, %arg3: memref<1x128xf32, #tpu.memory_space<vmem>>, %arg4: memref<128x128xf32, #tpu.memory_space<vmem>>, %arg5: memref<1x128xf32, #tpu.memory_space<vmem>>, %arg6: memref<128x128xf32, #tpu.memory_space<vmem>>, %arg7: memref<1x128xf32, #tpu.memory_space<vmem>>, %arg8: memref<8x128xf32, #tpu.memory_space<vmem>>) attributes {dimension_semantics = [#tpu.dimension_semantics<parallel>], iteration_bounds = array<i64: 1>, scalar_prefetch = 0 : i64, scratch_operands = 0 : i64, tpu.core_type = #tpu.core_type<tc>, window_params = [{transform_indices = @transform_0, window_bounds = array<i64: 8, 128>}, {pipeline_mode = #tpu.pipeline_mode<synchronous>, transform_indices = @transform_1, window_bounds = array<i64: 128, 128>}, {pipeline_mode = #tpu.pipeline_mode<synchronous>, transform_indices = @transform_2, window_bounds = array<i64: 1, 128>}, {pipeline_mode = #tpu.pipeline_mode<synchronous>, transform_indices = @transform_3, window_bounds = array<i64: 128, 128>}, {pipeline_mode = #tpu.pipeline_mode<synchronous>, transform_indices = @transform_4, window_bounds = array<i64: 1, 128>}, {pipeline_mode = #tpu.pipeline_mode<synchronous>, transform_indices = @transform_5, window_bounds = array<i64: 128, 128>}, {pipeline_mode = #tpu.pipeline_mode<synchronous>, transform_indices = @transform_6, window_bounds = array<i64: 1, 128>}, {transform_indices = @transform_7, window_bounds = array<i64: 8, 128>}]} {
    %c0 = arith.constant 0 : index
    %c0_0 = arith.constant 0 : index
    %0 = vector.load %arg1[%c0, %c0_0] : memref<8x128xf32, #tpu.memory_space<vmem>>, vector<8x128xf32>
    %c0_1 = arith.constant 0 : index
    %c0_2 = arith.constant 0 : index
    %1 = vector.load %arg2[%c0_1, %c0_2] : memref<128x128xf32, #tpu.memory_space<vmem>>, vector<128x128xf32>
    %cst = arith.constant dense<0.000000e+00> : vector<8x128xf32>
    %2 = tpu.matmul %0, %1, %cst {dimension_numbers = #tpu.dot_dimension_numbers<[1], [0], [0], [1], [0, 0, 1, 1], [], []>} : vector<8x128xf32>, vector<128x128xf32>, vector<8x128xf32> -> vector<8x128xf32>
    %c0_3 = arith.constant 0 : index
    %c0_4 = arith.constant 0 : index
    %3 = vector.load %arg3[%c0_3, %c0_4] : memref<1x128xf32, #tpu.memory_space<vmem>>, vector<1x128xf32>
    %4 = vector.broadcast %3 : vector<1x128xf32> to vector<8x128xf32>
    %5 = arith.addf %2, %4 : vector<8x128xf32>
    %6 = arith.negf %5 : vector<8x128xf32>
    %7 = math.exp %6 : vector<8x128xf32>
    %cst_5 = arith.constant 1.000000e+00 : f32
    %8 = vector.broadcast %cst_5 : f32 to vector<8x128xf32>
    %9 = arith.addf %8, %7 : vector<8x128xf32>
    %10 = arith.divf %8, %9 : vector<8x128xf32>
    %11 = arith.mulf %5, %10 : vector<8x128xf32>
    %c0_6 = arith.constant 0 : index
    %c0_7 = arith.constant 0 : index
    %12 = vector.load %arg4[%c0_6, %c0_7] : memref<128x128xf32, #tpu.memory_space<vmem>>, vector<128x128xf32>
    %cst_8 = arith.constant dense<0.000000e+00> : vector<8x128xf32>
    %13 = tpu.matmul %11, %12, %cst_8 {dimension_numbers = #tpu.dot_dimension_numbers<[1], [0], [0], [1], [0, 0, 1, 1], [], []>} : vector<8x128xf32>, vector<128x128xf32>, vector<8x128xf32> -> vector<8x128xf32>
    %c0_9 = arith.constant 0 : index
    %c0_10 = arith.constant 0 : index
    %14 = vector.load %arg5[%c0_9, %c0_10] : memref<1x128xf32, #tpu.memory_space<vmem>>, vector<1x128xf32>
    %15 = vector.broadcast %14 : vector<1x128xf32> to vector<8x128xf32>
    %16 = arith.addf %13, %15 : vector<8x128xf32>
    %17 = arith.negf %16 : vector<8x128xf32>
    %18 = math.exp %17 : vector<8x128xf32>
    %cst_11 = arith.constant 1.000000e+00 : f32
    %19 = vector.broadcast %cst_11 : f32 to vector<8x128xf32>
    %20 = arith.addf %19, %18 : vector<8x128xf32>
    %21 = arith.divf %19, %20 : vector<8x128xf32>
    %22 = arith.mulf %16, %21 : vector<8x128xf32>
    %c0_12 = arith.constant 0 : index
    %c0_13 = arith.constant 0 : index
    %23 = vector.load %arg6[%c0_12, %c0_13] : memref<128x128xf32, #tpu.memory_space<vmem>>, vector<128x128xf32>
    %cst_14 = arith.constant dense<0.000000e+00> : vector<8x128xf32>
    %24 = tpu.matmul %22, %23, %cst_14 {dimension_numbers = #tpu.dot_dimension_numbers<[1], [0], [0], [1], [0, 0, 1, 1], [], []>} : vector<8x128xf32>, vector<128x128xf32>, vector<8x128xf32> -> vector<8x128xf32>
    %c0_15 = arith.constant 0 : index
    %c0_16 = arith.constant 0 : index
    %25 = vector.load %arg7[%c0_15, %c0_16] : memref<1x128xf32, #tpu.memory_space<vmem>>, vector<1x128xf32>
    %26 = vector.broadcast %25 : vector<1x128xf32> to vector<8x128xf32>
    %27 = arith.addf %24, %26 : vector<8x128xf32>
    %c0_17 = arith.constant 0 : index
    %c0_18 = arith.constant 0 : index
    %28 = vector.load %arg8[%c0_17, %c0_18] : memref<8x128xf32, #tpu.memory_space<vmem>>, vector<8x128xf32>
    tpu.vector_store %arg8[%c0_17, %c0_18], %27 {strides = array<i32>} : memref<8x128xf32, #tpu.memory_space<vmem>>, vector<8x128xf32>,
    return
  }
  func.func @transform_0(%arg0: i32) -> (i32, i32) {
    %c0_i32 = arith.constant 0 : i32
    %c0_i32_0 = arith.constant 0 : i32
    return %arg0, %c0_i32 : i32, i32
  }
  func.func @transform_1(%arg0: i32) -> (i32, i32) {
    %c0_i32 = arith.constant 0 : i32
    %c0_i32_0 = arith.constant 0 : i32
    %c0_i32_1 = arith.constant 0 : i32
    return %c0_i32, %c0_i32_0 : i32, i32
  }
  func.func @transform_2(%arg0: i32) -> (i32, i32) {
    %c0_i32 = arith.constant 0 : i32
    %c0_i32_0 = arith.constant 0 : i32
    %c0_i32_1 = arith.constant 0 : i32
    return %c0_i32, %c0_i32_0 : i32, i32
  }
  func.func @transform_3(%arg0: i32) -> (i32, i32) {
    %c0_i32 = arith.constant 0 : i32
    %c0_i32_0 = arith.constant 0 : i32
    %c0_i32_1 = arith.constant 0 : i32
    return %c0_i32, %c0_i32_0 : i32, i32
  }
  func.func @transform_4(%arg0: i32) -> (i32, i32) {
    %c0_i32 = arith.constant 0 : i32
    %c0_i32_0 = arith.constant 0 : i32
    %c0_i32_1 = arith.constant 0 : i32
    return %c0_i32, %c0_i32_0 : i32, i32
  }
  func.func @transform_5(%arg0: i32) -> (i32, i32) {
    %c0_i32 = arith.constant 0 : i32
    %c0_i32_0 = arith.constant 0 : i32
    %c0_i32_1 = arith.constant 0 : i32
    return %c0_i32, %c0_i32_0 : i32, i32
  }
  func.func @transform_6(%arg0: i32) -> (i32, i32) {
    %c0_i32 = arith.constant 0 : i32
    %c0_i32_0 = arith.constant 0 : i32
    %c0_i32_1 = arith.constant 0 : i32
    return %c0_i32, %c0_i32_0 : i32, i32
  }
  func.func @transform_7(%arg0: i32) -> (i32, i32) {
    %c0_i32 = arith.constant 0 : i32
    %c0_i32_0 = arith.constant 0 : i32
    return %arg0, %c0_i32 : i32, i32
  }
}

</mosaic_0001>

<bundles_post_ra>
// kernel: tpu_custom_call.1
= control target key start
LH: loop header
LB: loop body
LE: loop exit
PB: predicated region body
PF: predicated region fallthrough
CT: control target
= control target key end

     0   :  { %12 = vsyncpa [#allocation3], 0  ;;  %s916_s0 = inlined_call_operand.hbm [shape: f32[8,128], index: 0, kind: input, shape index: {}]   ;;  %s917_s1 = inlined_call_operand.hbm [shape: f32[128,128], index: 1, kind: input, shape index: {}]   ;;  %s918_s2 = inlined_call_operand.vmem [shape: f32[1,128], index: 2, kind: input, shape index: {}]   ;;  %s919_s3 = inlined_call_operand.hbm [shape: f32[128,128], index: 3, kind: input, shape index: {}]   ;;  %s920_s4 = inlined_call_operand.vmem [shape: f32[1,128], index: 4, kind: input, shape index: {}]   ;;  %s921_s5 = inlined_call_operand.hbm [shape: f32[128,128], index: 5, kind: input, shape index: {}]   ;;  %s922_s6 = inlined_call_operand.vmem [shape: f32[1,128], index: 6, kind: input, shape index: {}]   ;;  %s923_s7 = inlined_call_operand.hbm [shape: f32[8,128], index: 7, kind: output, shape index: {}]  }
   0x1   :  { %13 = vsyncpa [#allocation6], 0 }
   0x2   :  { %14 = vsyncpa [#allocation9], 0 }
   0x3   :  { %15 = vsyncpa [#allocation4], 0  ;;  %s761_s24 = smov [#allocation5]   ;;  %s643_s28 = scalar_lea.hbm %s917_s1, 2048 }
   0x4   :  { %s31_s25 = sshll.u32 %s761_s24, 4  ;;  %p644_p0 = scmp.ne.s32.totalorder %s917_s1, %s643_s28  ;;  %s32_s25 = int_to_ptr.vmem [resolvable:$true] %s31_s25 }
   0x5   :  { %p647_p1 = scmp.lt.u32.totalorder %s643_s28, %s917_s1 }
   0x7   :  { %p649_p2 = pnand %p647_p1, %p644_p0 }
   0x9   :  { %652 = shalt.err (!%p649_p2)
}
   0xa   :  { %s653_s10 = scalar_lea.vmem %s32_s25, 2048  ;;  %p658_p4 = scmp.lt.s32.totalorder %s32_s25, %s32_s25 }
   0xb   :  { %p654_p3 = scmp.ne.s32.totalorder %s32_s25, %s653_s10  ;;  %p659_p5 = scmp.lt.s32.totalorder %s653_s10, %s653_s10 }
   0xd   :  { %p660_p6 = por %p659_p5, %p658_p4 }
   0xf   :  { %p661_p7 = pnand %p660_p6, %p654_p3 }
  0x11   :  { %664 = shalt.err (!%p661_p7)
}
  0x12   :  { %s762_s11 = smov 128   ;;  %s763_s12 = smov 8  }
  0x13   :  { %37 = dma.hbm_to_vmem [thread:$0]  %s917_s1, 2048, %s32_s25, [#allocation6], %s762_s11, %s762_s11, %s763_s12  }
  0x14   :  { %s764_s15 = smov [#allocation2]   ;;  %s765_s17 = smov [#allocation7]  }
  0x15   :  { %s22_s16 = sshll.u32 %s764_s15, 4  ;;  %s45_s18 = sshll.u32 %s765_s17, 4  ;;  %s23_s16 = int_to_ptr.vmem [resolvable:$true] %s22_s16  ;;  %s46_s18 = int_to_ptr.vmem [resolvable:$true] %s45_s18 }
  0x16   :  { %s665_s21 = scalar_lea.hbm %s916_s0, 128 }
  0x17   :  { %p666_p8 = scmp.ne.s32.totalorder %s916_s0, %s665_s21  ;;  %p669_p9 = scmp.lt.u32.totalorder %s665_s21, %s916_s0 }
  0x19   :  { %p671_p10 = pnand %p669_p9, %p666_p8 }
  0x1b   :  { %674 = shalt.err (!%p671_p10)
}
  0x1c   :  { %s675_s1 = scalar_lea.vmem %s23_s16, 128  ;;  %p680_p12 = scmp.lt.s32.totalorder %s23_s16, %s23_s16 }
  0x1d   :  { %p676_p11 = scmp.ne.s32.totalorder %s23_s16, %s675_s1  ;;  %p681_p13 = scmp.lt.s32.totalorder %s675_s1, %s675_s1 }
  0x1f   :  { %p682_p0 = por %p681_p13, %p680_p12 }
  0x21   :  { %p683_p1 = pnand %p682_p0, %p676_p11 }
  0x23   :  { %686 = shalt.err (!%p683_p1)
}
  0x24   :  { %25 = dma.hbm_to_vmem [thread:$0]  %s916_s0, 128, %s23_s16, [#allocation3]  }
  0x25   :  { %s687_s30 = scalar_lea.hbm %s919_s3, 2048 }
  0x26   :  { %p688_p2 = scmp.ne.s32.totalorder %s919_s3, %s687_s30  ;;  %p691_p3 = scmp.lt.u32.totalorder %s687_s30, %s919_s3 }
  0x28   :  { %p693_p4 = pnand %p691_p3, %p688_p2 }
  0x2a   :  { %696 = shalt.err (!%p693_p4)
}
  0x2b   :  { %s697_s14 = scalar_lea.vmem %s46_s18, 2048  ;;  %p702_p6 = scmp.lt.s32.totalorder %s46_s18, %s46_s18 }
  0x2c   :  { %p698_p5 = scmp.ne.s32.totalorder %s46_s18, %s697_s14  ;;  %p703_p7 = scmp.lt.s32.totalorder %s697_s14, %s697_s14 }
  0x2e   :  { %p704_p8 = por %p703_p7, %p702_p6 }
  0x30   :  { %p705_p9 = pnand %p704_p8, %p698_p5 }
  0x32   :  { %708 = shalt.err (!%p705_p9)
}
  0x33   :  { %51 = dma.hbm_to_vmem [thread:$0]  %s919_s3, 2048, %s46_s18, [#allocation6], %s762_s11, %s762_s11, %s763_s12  }
  0x34   :  { %s766_s16 = smov [#allocation8]   ;;  %s709_s21 = scalar_lea.hbm %s921_s5, 2048 }
  0x35   :  { %s59_s17 = sshll.u32 %s766_s16, 4  ;;  %p710_p10 = scmp.ne.s32.totalorder %s921_s5, %s709_s21  ;;  %s60_s17 = int_to_ptr.vmem [resolvable:$true] %s59_s17 }
  0x36   :  { %p713_p11 = scmp.lt.u32.totalorder %s709_s21, %s921_s5 }
  0x38   :  { %p715_p12 = pnand %p713_p11, %p710_p10 }
  0x3a   :  { %718 = shalt.err (!%p715_p12)
}
  0x3b   :  { %s719_s1 = scalar_lea.vmem %s60_s17, 2048  ;;  %p724_p0 = scmp.lt.s32.totalorder %s60_s17, %s60_s17 }
  0x3c   :  { %p720_p13 = scmp.ne.s32.totalorder %s60_s17, %s719_s1  ;;  %p725_p1 = scmp.lt.s32.totalorder %s719_s1, %s719_s1 }
  0x3e   :  { %p726_p2 = por %p725_p1, %p724_p0 }
  0x40   :  { %p727_p3 = pnand %p726_p2, %p720_p13 }
  0x42   :  { %730 = shalt.err (!%p727_p3)
}
  0x43   :  { %65 = dma.hbm_to_vmem [thread:$0]  %s921_s5, 2048, %s60_s17, [#allocation9], %s762_s11, %s762_s11, %s763_s12  }
  0x44   :  { %753 = dma.done.wait [#allocation3], 128  }
  0x45   :  { %754 = vsyncadd [#allocation3], 4294967168 }
  0x46   :  { %755 = dma.done.wait [#allocation6], 4096  }
  0x47   :  { %756 = vsyncadd [#allocation6], 4294963200 }
  0x48   :  { %757 = dma.done.wait [#allocation9], 2048  }
  0x49   :  { %758 = vsyncadd [#allocation9], 4294965248  ;;  %v767_v0 = vmov 0.0|0.0   ;;  %vm768_vm0 = vmmov 0   ;;  %v769_v1 = vmov 0.0   ;;  %v81_v2 = vld [vmem:[#allocation5] sm:$0xff] }
  0x4a   :  { %553 = vmatprep.subr.bf16.mxu0 %v767_v0  ;;  %480 = vmatprep.mubr.msk.f32.mxu0 %vm768_vm0, %v769_v1  ;;  %v82_v3 = vld [vmem:[#allocation5 + $0x8] sm:$0xff]  ;;  %v83_v4 = vld [vmem:[#allocation5 + $0x10] sm:$0xff]  ;;  %v84_v6 = vld [vmem:[#allocation5 + $0x18] sm:$0xff]  ;;  %s770_s28 = smov [#allocation10]  }
  0x4b   :  { %577 = vmatprep.subr.bf16.mxu1 %v767_v0  ;;  %515 = vmatprep.mubr.msk.f32.mxu1 %vm768_vm0, %v769_v1  ;;  %v554_v5 = vpack.c.bf16 %v82_v3, %v81_v2  ;;  %v557_v7 = vpack.c.bf16 %v84_v6, %v83_v4  ;;  %v85_v8 = vld [vmem:[#allocation5 + $0x20] sm:$0xff]  ;;  %v86_v9 = vld [vmem:[#allocation5 + $0x28] sm:$0xff]  ;;  %v87_v11 = vld [vmem:[#allocation5 + $0x30] sm:$0xff]  ;;  %s381_s29 = sshll.u32 %s770_s28, 4  ;;  %s382_s29 = int_to_ptr.vmem [resolvable:$true] %s381_s29 }
  0x4c   :  { %v560_v10 = vpack.c.bf16 %v86_v9, %v85_v8  ;;  %v88_v12 = vld [vmem:[#allocation5 + $0x38] sm:$0xff]  ;;  %v89_v14 = vld [vmem:[#allocation5 + $0x40] sm:$0xff]  ;;  %v90_v15 = vld [vmem:[#allocation5 + $0x48] sm:$0xff]  ;;  %p736_p5 = scmp.lt.s32.totalorder %s382_s29, %s382_s29 }
  0x4d   :  { %555 = vmatpush3.bf16.msra.mxu0 %v554_v5  ;;  %v563_v13 = vpack.c.bf16 %v88_v12, %v87_v11  ;;  %v566_v16 = vpack.c.bf16 %v90_v15, %v89_v14  ;;  %v91_v17 = vld [vmem:[#allocation5 + $0x50] sm:$0xff]  ;;  %v92_v18 = vld [vmem:[#allocation5 + $0x58] sm:$0xff]  ;;  %v93_v20 = vld [vmem:[#allocation5 + $0x60] sm:$0xff] }
  0x4e   :  { %556 = vmatprep.subr.bf16.mxu0 %v767_v0  ;;  %v569_v19 = vpack.c.bf16 %v92_v18, %v91_v17  ;;  %v94_v21 = vld [vmem:[#allocation5 + $0x68] sm:$0xff]  ;;  %v95_v23 = vld [vmem:[#allocation5 + $0x70] sm:$0xff]  ;;  %v96_v24 = vld [vmem:[#allocation5 + $0x78] sm:$0xff] }
  0x4f   :  { %v572_v22 = vpack.c.bf16 %v94_v21, %v93_v20  ;;  %v575_v25 = vpack.c.bf16 %v96_v24, %v95_v23  ;;  %v80_v26 = vld [vmem:[#allocation2] sm:$0xff]  ;;  %v181_v27 = vld [vmem:[#allocation7] sm:$0xff]  ;;  %v182_v28 = vld [vmem:[#allocation7 + $0x8] sm:$0xff] }
  0x50   :  { %v578_v29 = vpack.c.bf16 %v182_v28, %v181_v27  ;;  %v183_v30 = vld [vmem:[#allocation7 + $0x10] sm:$0xff]  ;;  %v184_v31 = vld [vmem:[#allocation7 + $0x18] sm:$0xff]  ;;  %v185_v33 = vld [vmem:[#allocation7 + $0x20] sm:$0xff] }
  0x51   :  { %558 = vmatpush3.bf16.msra.mxu0 %v557_v7  ;;  %v581_v32 = vpack.c.bf16 %v184_v31, %v183_v30  ;;  %v186_v34 = vld [vmem:[#allocation7 + $0x28] sm:$0xff]  ;;  %v187_v36 = vld [vmem:[#allocation7 + $0x30] sm:$0xff]  ;;  %v188_v37 = vld [vmem:[#allocation7 + $0x38] sm:$0xff] }
  0x52   :  { %559 = vmatprep.subr.bf16.mxu0 %v767_v0  ;;  %579 = vmatpush3.bf16.msra.mxu1 %v578_v29  ;;  %v584_v35 = vpack.c.bf16 %v186_v34, %v185_v33  ;;  %v587_v38 = vpack.c.bf16 %v188_v37, %v187_v36  ;;  %v189_v39 = vld [vmem:[#allocation7 + $0x40] sm:$0xff]  ;;  %v190_v40 = vld [vmem:[#allocation7 + $0x48] sm:$0xff]  ;;  %v191_v42 = vld [vmem:[#allocation7 + $0x50] sm:$0xff] }
  0x53   :  { %580 = vmatprep.subr.bf16.mxu1 %v767_v0  ;;  %v590_v41 = vpack.c.bf16 %v190_v40, %v189_v39  ;;  %v192_v43 = vld [vmem:[#allocation7 + $0x58] sm:$0xff]  ;;  %v193_v45 = vld [vmem:[#allocation7 + $0x60] sm:$0xff]  ;;  %v194_v46 = vld [vmem:[#allocation7 + $0x68] sm:$0xff] }
  0x54   :  { %v593_v44 = vpack.c.bf16 %v192_v43, %v191_v42  ;;  %v596_v47 = vpack.c.bf16 %v194_v46, %v193_v45  ;;  %v195_v48 = vld [vmem:[#allocation7 + $0x70] sm:$0xff]  ;;  %v196_v49 = vld [vmem:[#allocation7 + $0x78] sm:$0xff]  ;;  %v281_v60 = vld [vmem:[#allocation8] sm:$0xff] }
  0x55   :  { %561 = vmatpush3.bf16.msra.mxu0 %v560_v10  ;;  %v599_v50 = vpack.c.bf16 %v196_v49, %v195_v48  ;;  %v392_v51 = vld [vmem:[%s918_s2] ss:$0 sm:$0xff]  ;;  %v282_v61 = vld [vmem:[#allocation8 + $0x8] sm:$0xff]  ;;  %v283_v63 = vld [vmem:[#allocation8 + $0x10] sm:$0xff] }
  0x56   :  { %562 = vmatprep.subr.bf16.mxu0 %v767_v0  ;;  %582 = vmatpush3.bf16.msra.mxu1 %v581_v32  ;;  %v602_v62 = vpack.c.bf16 %v282_v61, %v281_v60  ;;  %v285_v3 = vld [vmem:[#allocation8 + $0x20] sm:$0xff]  ;;  %v286_v4 = vld [vmem:[#allocation8 + $0x28] sm:$0xff]  ;;  %v287_v6 = vld [vmem:[#allocation8 + $0x30] sm:$0xff] }
  0x57   :  { %583 = vmatprep.subr.bf16.mxu1 %v767_v0  ;;  %v608_v5 = vpack.c.bf16 %v286_v4, %v285_v3  ;;  %v288_v7 = vld [vmem:[#allocation8 + $0x38] sm:$0xff]  ;;  %v289_v9 = vld [vmem:[#allocation8 + $0x40] sm:$0xff]  ;;  %v290_v10 = vld [vmem:[#allocation8 + $0x48] sm:$0xff] }
  0x58   :  { %v611_v8 = vpack.c.bf16 %v288_v7, %v287_v6  ;;  %v614_v11 = vpack.c.bf16 %v290_v10, %v289_v9  ;;  %v291_v12 = vld [vmem:[#allocation8 + $0x50] sm:$0xff]  ;;  %v293_v15 = vld [vmem:[#allocation8 + $0x60] sm:$0xff]  ;;  %v394_v21 = vld [vmem:[%s920_s4] ss:$0 sm:$0xff]  ;;  %s731_s4 = scalar_lea.vmem %s382_s29, 128 }
  0x59   :  { %564 = vmatpush3.bf16.msra.mxu0 %v563_v13  ;;  %v292_v13 = vld [vmem:[#allocation8 + $0x58] sm:$0xff]  ;;  %v295_v18 = vld [vmem:[#allocation8 + $0x70] sm:$0xff]  ;;  %p732_p4 = scmp.ne.s32.totalorder %s382_s29, %s731_s4  ;;  %p737_p6 = scmp.lt.s32.totalorder %s731_s4, %s731_s4 }
  0x5a   :  { %565 = vmatprep.subr.bf16.mxu0 %v767_v0  ;;  %585 = vmatpush3.bf16.msra.mxu1 %v584_v35  ;;  %v617_v14 = vpack.c.bf16 %v292_v13, %v291_v12 }
  0x5b   :  { %586 = vmatprep.subr.bf16.mxu1 %v767_v0  ;;  %p738_p7 = por %p737_p6, %p736_p5 }
  0x5d   :  { %567 = vmatpush3.bf16.msra.mxu0 %v566_v16  ;;  %v294_v16 = vld [vmem:[#allocation8 + $0x68] sm:$0xff]  ;;  %p739_p8 = pnand %p738_p7, %p732_p4 }
  0x5e   :  { %568 = vmatprep.subr.bf16.mxu0 %v767_v0  ;;  %588 = vmatpush3.bf16.msra.mxu1 %v587_v38  ;;  %v620_v17 = vpack.c.bf16 %v294_v16, %v293_v15 }
  0x5f   :  { %589 = vmatprep.subr.bf16.mxu1 %v767_v0 }
  0x61   :  { %570 = vmatpush3.bf16.msra.mxu0 %v569_v19  ;;  %v296_v19 = vld [vmem:[#allocation8 + $0x78] sm:$0xff] }
  0x62   :  { %571 = vmatprep.subr.bf16.mxu0 %v767_v0  ;;  %591 = vmatpush3.bf16.msra.mxu1 %v590_v41  ;;  %v623_v20 = vpack.c.bf16 %v296_v19, %v295_v18 }
  0x63   :  { %592 = vmatprep.subr.bf16.mxu1 %v767_v0 }
  0x65   :  { %573 = vmatpush3.bf16.msra.mxu0 %v572_v22 }
  0x66   :  { %574 = vmatprep.subr.bf16.mxu0 %v767_v0  ;;  %594 = vmatpush3.bf16.msra.mxu1 %v593_v44 }
  0x67   :  { %595 = vmatprep.subr.bf16.mxu1 %v767_v0 }
  0x69   :  { %576 = vmatpush3.bf16.msra.mxu0 %v575_v25 }
  0x6a   :  { %601 = vmatprep.subr.bf16.mxu0 %v767_v0  ;;  %597 = vmatpush3.bf16.msra.mxu1 %v596_v47 }
  0x6b   :  { %598 = vmatprep.subr.bf16.mxu1 %v767_v0 }
  0x6c   :  { %481 = vmatmul.mubr.f32.vlgmr.msra.gmra.mrb[0].mxu0 %v80_v26 }
  0x6d   :  { %550 = vmatprep.mubr.msk.f32.mxu0 %vm768_vm0, %v769_v1  ;;  %603 = vmatpush3.bf16.msra.mxu0 %v602_v62  ;;  %v284_v1 = vld [vmem:[#allocation8 + $0x18] sm:$0xff] }
  0x6e   :  { %600 = vmatpush3.bf16.msra.mxu1 %v599_v50  ;;  %604 = vmatprep.subr.bf16.mxu0 %v767_v0  ;;  %v605_v2 = vpack.c.bf16 %v284_v1, %v283_v63 }
  0x71   :  { %606 = vmatpush3.bf16.msra.mxu0 %v605_v2 }
  0x72   :  { %607 = vmatprep.subr.bf16.mxu0 %v767_v0 }
  0x75   :  { %609 = vmatpush3.bf16.msra.mxu0 %v608_v5 }
  0x76   :  { %610 = vmatprep.subr.bf16.mxu0 %v767_v0 }
  0x79   :  { %612 = vmatpush3.bf16.msra.mxu0 %v611_v8 }
  0x7a   :  { %613 = vmatprep.subr.bf16.mxu0 %v767_v0 }
  0x7d   :  { %615 = vmatpush3.bf16.msra.mxu0 %v614_v11 }
  0x7e   :  { %616 = vmatprep.subr.bf16.mxu0 %v767_v0 }
  0x81   :  { %618 = vmatpush3.bf16.msra.mxu0 %v617_v14 }
  0x82   :  { %619 = vmatprep.subr.bf16.mxu0 %v767_v0 }
  0x85   :  { %621 = vmatpush3.bf16.msra.mxu0 %v620_v17 }
  0x86   :  { %622 = vmatprep.subr.bf16.mxu0 %v767_v0  ;;  %v396_v0 = vld [vmem:[%s922_s6] ss:$0 sm:$0xff] }
  0x89   :  { %624 = vmatpush3.bf16.msra.mxu0 %v623_v20 }
 0x13f   :  { %v170_v52 = vpop.f32.mrb[0].mxu0 }
 0x140   :  { %v171_v53 = vadd.f32 %v392_v51, %v170_v52  ;;  %v482_v54 = vpop.f32.mrb[1].mxu0 }
 0x142   :  { %v393_v55 = vmul.f32 -1.442695, %v171_v53 }
 0x144   :  { %635 = vpow2.f32 %v393_v55 }
 0x14e   :  { %v636_v56 = vpop.eup %635 }
 0x14f   :  { %v177_v57 = vadd.f32 1.0, %v636_v56 }
 0x151   :  { %637 = vrcp.f32 %v177_v57 }
 0x15b   :  { %v638_v58 = vpop.eup %637 }
 0x15c   :  { %v180_v59 = vmul.f32 %v638_v58, %v171_v53 }
 0x15e   :  { %516 = vmatmul.mubr.f32.vlgmr.msra.gmra.mrb[0].mxu1 %v180_v59 }
 0x231   :  { %v270_v22 = vpop.f32.mrb[0].mxu1 }
 0x232   :  { %v271_v23 = vadd.f32 %v394_v21, %v270_v22  ;;  %v517_v24 = vpop.f32.mrb[1].mxu1 }
 0x234   :  { %v395_v25 = vmul.f32 -1.442695, %v271_v23 }
 0x236   :  { %639 = vpow2.f32 %v395_v25 }
 0x240   :  { %v640_v26 = vpop.eup %639 }
 0x241   :  { %v277_v27 = vadd.f32 1.0, %v640_v26 }
 0x243   :  { %641 = vrcp.f32 %v277_v27 }
 0x24d   :  { %v642_v28 = vpop.eup %641 }
 0x24e   :  { %v280_v29 = vmul.f32 %v642_v28, %v271_v23 }
 0x250   :  { %551 = vmatmul.mubr.f32.vlgmr.msra.gmra.mrb[2].mxu0 %v280_v29 }
 0x323   :  { %v370_v30 = vpop.f32.mrb[2].mxu0 }
 0x324   :  { %v371_v31 = vadd.f32 %v396_v0, %v370_v30  ;;  %v552_v32 = vpop.f32.mrb[3].mxu0 }
 0x326   :  { %374 = vst [vmem:[#allocation10] sm:$0xff] %v371_v31 }
 0x327   :  { %742 = shalt.err (!%p739_p8)
}
 0x328   :  { %s743_s9 = scalar_lea.hbm %s923_s7, 128 }
 0x329   :  { %p744_p9 = scmp.ne.s32.totalorder %s923_s7, %s743_s9  ;;  %p747_p10 = scmp.lt.u32.totalorder %s743_s9, %s923_s7 }
 0x32b   :  { %p749_p11 = pnand %p747_p10, %p744_p9 }
 0x32d   :  { %752 = shalt.err (!%p749_p11)
}
 0x32e   :  { %384 = dma.vmem_to_hbm [thread:$0]  %s382_s29, 128, %s923_s7, [#allocation4]  }
 0x32f   :  { %759 = dma.done.wait [#allocation4], 128  }
 0x330   :  { %760 = vsyncadd [#allocation4], 4294967168 }
 0x331   :  { %388 = vsyncpa [#allocation3], 1 }
 0x332   :  { %389 = vsyncpa [#allocation6], 1 }
 0x333   :  { %390 = vsyncpa [#allocation9], 1 }
 0x334   :  { %391 = vsyncpa [#allocation4], 1 }

// kernel: tpu_custom_call.1
= control target key start
LH: loop header
LB: loop body
LE: loop exit
PB: predicated region body
PF: predicated region fallthrough
CT: control target
= control target key end

     0   :  { %12 = vsyncpa [#allocation3], 0  ;;  %s916_s0 = inlined_call_operand.hbm [shape: f32[8,128], index: 0, kind: input, shape index: {}]   ;;  %s917_s1 = inlined_call_operand.hbm [shape: f32[128,128], index: 1, kind: input, shape index: {}]   ;;  %s918_s2 = inlined_call_operand.vmem [shape: f32[1,128], index: 2, kind: input, shape index: {}]   ;;  %s919_s3 = inlined_call_operand.hbm [shape: f32[128,128], index: 3, kind: input, shape index: {}]   ;;  %s920_s4 = inlined_call_operand.vmem [shape: f32[1,128], index: 4, kind: input, shape index: {}]   ;;  %s921_s5 = inlined_call_operand.hbm [shape: f32[128,128], index: 5, kind: input, shape index: {}]   ;;  %s922_s6 = inlined_call_operand.vmem [shape: f32[1,128], index: 6, kind: input, shape index: {}]   ;;  %s923_s7 = inlined_call_operand.hbm [shape: f32[8,128], index: 7, kind: output, shape index: {}]  }
   0x1   :  { %13 = vsyncpa [#allocation6], 0 }
   0x2   :  { %14 = vsyncpa [#allocation9], 0 }
   0x3   :  { %15 = vsyncpa [#allocation4], 0  ;;  %s761_s24 = smov [#allocation5]   ;;  %s643_s28 = scalar_lea.hbm %s917_s1, 2048 }
   0x4   :  { %s31_s25 = sshll.u32 %s761_s24, 4  ;;  %p644_p0 = scmp.ne.s32.totalorder %s917_s1, %s643_s28  ;;  %s32_s25 = int_to_ptr.vmem [resolvable:$true] %s31_s25 }
   0x5   :  { %p647_p1 = scmp.lt.u32.totalorder %s643_s28, %s917_s1 }
   0x7   :  { %p649_p2 = pnand %p647_p1, %p644_p0 }
   0x9   :  { %652 = shalt.err (!%p649_p2)
}
   0xa   :  { %s653_s10 = scalar_lea.vmem %s32_s25, 2048  ;;  %p658_p4 = scmp.lt.s32.totalorder %s32_s25, %s32_s25 }
   0xb   :  { %p654_p3 = scmp.ne.s32.totalorder %s32_s25, %s653_s10  ;;  %p659_p5 = scmp.lt.s32.totalorder %s653_s10, %s653_s10 }
   0xd   :  { %p660_p6 = por %p659_p5, %p658_p4 }
   0xf   :  { %p661_p7 = pnand %p660_p6, %p654_p3 }
  0x11   :  { %664 = shalt.err (!%p661_p7)
}
  0x12   :  { %s762_s11 = smov 128   ;;  %s763_s12 = smov 8  }
  0x13   :  { %37 = dma.hbm_to_vmem [thread:$0]  %s917_s1, 2048, %s32_s25, [#allocation6], %s762_s11, %s762_s11, %s763_s12  }
  0x14   :  { %s764_s15 = smov [#allocation2]   ;;  %s765_s17 = smov [#allocation7]  }
  0x15   :  { %s22_s16 = sshll.u32 %s764_s15, 4  ;;  %s45_s18 = sshll.u32 %s765_s17, 4  ;;  %s23_s16 = int_to_ptr.vmem [resolvable:$true] %s22_s16  ;;  %s46_s18 = int_to_ptr.vmem [resolvable:$true] %s45_s18 }
  0x16   :  { %s665_s21 = scalar_lea.hbm %s916_s0, 128 }
  0x17   :  { %p666_p8 = scmp.ne.s32.totalorder %s916_s0, %s665_s21  ;;  %p669_p9 = scmp.lt.u32.totalorder %s665_s21, %s916_s0 }
  0x19   :  { %p671_p10 = pnand %p669_p9, %p666_p8 }
  0x1b   :  { %674 = shalt.err (!%p671_p10)
}
  0x1c   :  { %s675_s1 = scalar_lea.vmem %s23_s16, 128  ;;  %p680_p12 = scmp.lt.s32.totalorder %s23_s16, %s23_s16 }
  0x1d   :  { %p676_p11 = scmp.ne.s32.totalorder %s23_s16, %s675_s1  ;;  %p681_p13 = scmp.lt.s32.totalorder %s675_s1, %s675_s1 }
  0x1f   :  { %p682_p0 = por %p681_p13, %p680_p12 }
  0x21   :  { %p683_p1 = pnand %p682_p0, %p676_p11 }
  0x23   :  { %686 = shalt.err (!%p683_p1)
}
  0x24   :  { %25 = dma.hbm_to_vmem [thread:$0]  %s916_s0, 128, %s23_s16, [#allocation3]  }
  0x25   :  { %s687_s30 = scalar_lea.hbm %s919_s3, 2048 }
  0x26   :  { %p688_p2 = scmp.ne.s32.totalorder %s919_s3, %s687_s30  ;;  %p691_p3 = scmp.lt.u32.totalorder %s687_s30, %s919_s3 }
  0x28   :  { %p693_p4 = pnand %p691_p3, %p688_p2 }
  0x2a   :  { %696 = shalt.err (!%p693_p4)
}
  0x2b   :  { %s697_s14 = scalar_lea.vmem %s46_s18, 2048  ;;  %p702_p6 = scmp.lt.s32.totalorder %s46_s18, %s46_s18 }
  0x2c   :  { %p698_p5 = scmp.ne.s32.totalorder %s46_s18, %s697_s14  ;;  %p703_p7 = scmp.lt.s32.totalorder %s697_s14, %s697_s14 }
  0x2e   :  { %p704_p8 = por %p703_p7, %p702_p6 }
  0x30   :  { %p705_p9 = pnand %p704_p8, %p698_p5 }
  0x32   :  { %708 = shalt.err (!%p705_p9)
}
  0x33   :  { %51 = dma.hbm_to_vmem [thread:$0]  %s919_s3, 2048, %s46_s18, [#allocation6], %s762_s11, %s762_s11, %s763_s12  }
  0x34   :  { %s766_s16 = smov [#allocation8]   ;;  %s709_s21 = scalar_lea.hbm %s921_s5, 2048 }
  0x35   :  { %s59_s17 = sshll.u32 %s766_s16, 4  ;;  %p710_p10 = scmp.ne.s32.totalorder %s921_s5, %s709_s21  ;;  %s60_s17 = int_to_ptr.vmem [resolvable:$true] %s59_s17 }
  0x36   :  { %p713_p11 = scmp.lt.u32.totalorder %s709_s21, %s921_s5 }
  0x38   :  { %p715_p12 = pnand %p713_p11, %p710_p10 }
  0x3a   :  { %718 = shalt.err (!%p715_p12)
}
  0x3b   :  { %s719_s1 = scalar_lea.vmem %s60_s17, 2048  ;;  %p724_p0 = scmp.lt.s32.totalorder %s60_s17, %s60_s17 }
  0x3c   :  { %p720_p13 = scmp.ne.s32.totalorder %s60_s17, %s719_s1  ;;  %p725_p1 = scmp.lt.s32.totalorder %s719_s1, %s719_s1 }
  0x3e   :  { %p726_p2 = por %p725_p1, %p724_p0 }
  0x40   :  { %p727_p3 = pnand %p726_p2, %p720_p13 }
  0x42   :  { %730 = shalt.err (!%p727_p3)
}
  0x43   :  { %65 = dma.hbm_to_vmem [thread:$0]  %s921_s5, 2048, %s60_s17, [#allocation9], %s762_s11, %s762_s11, %s763_s12  }
  0x44   :  { %753 = dma.done.wait [#allocation3], 128  }
  0x45   :  { %754 = vsyncadd [#allocation3], 4294967168 }
  0x46   :  { %755 = dma.done.wait [#allocation6], 4096  }
  0x47   :  { %756 = vsyncadd [#allocation6], 4294963200 }
  0x48   :  { %757 = dma.done.wait [#allocation9], 2048  }
  0x49   :  { %758 = vsyncadd [#allocation9], 4294965248  ;;  %v767_v0 = vmov 0.0|0.0   ;;  %vm768_vm0 = vmmov 0   ;;  %v769_v1 = vmov 0.0   ;;  %v81_v2 = vld [vmem:[#allocation5] sm:$0xff] }
  0x4a   :  { %553 = vmatprep.subr.bf16.mxu0 %v767_v0  ;;  %480 = vmatprep.mubr.msk.f32.mxu0 %vm768_vm0, %v769_v1  ;;  %v82_v3 = vld [vmem:[#allocation5 + $0x8] sm:$0xff]  ;;  %v83_v4 = vld [vmem:[#allocation5 + $0x10] sm:$0xff]  ;;  %v84_v6 = vld [vmem:[#allocation5 + $0x18] sm:$0xff]  ;;  %s770_s28 = smov [#allocation10]  }
  0x4b   :  { %577 = vmatprep.subr.bf16.mxu1 %v767_v0  ;;  %515 = vmatprep.mubr.msk.f32.mxu1 %vm768_vm0, %v769_v1  ;;  %v554_v5 = vpack.c.bf16 %v82_v3, %v81_v2  ;;  %v557_v7 = vpack.c.bf16 %v84_v6, %v83_v4  ;;  %v85_v8 = vld [vmem:[#allocation5 + $0x20] sm:$0xff]  ;;  %v86_v9 = vld [vmem:[#allocation5 + $0x28] sm:$0xff]  ;;  %v87_v11 = vld [vmem:[#allocation5 + $0x30] sm:$0xff]  ;;  %s381_s29 = sshll.u32 %s770_s28, 4  ;;  %s382_s29 = int_to_ptr.vmem [resolvable:$true] %s381_s29 }
  0x4c   :  { %v560_v10 = vpack.c.bf16 %v86_v9, %v85_v8  ;;  %v88_v12 = vld [vmem:[#allocation5 + $0x38] sm:$0xff]  ;;  %v89_v14 = vld [vmem:[#allocation5 + $0x40] sm:$0xff]  ;;  %v90_v15 = vld [vmem:[#allocation5 + $0x48] sm:$0xff]  ;;  %p736_p5 = scmp.lt.s32.totalorder %s382_s29, %s382_s29 }
  0x4d   :  { %555 = vmatpush3.bf16.msra.mxu0 %v554_v5  ;;  %v563_v13 = vpack.c.bf16 %v88_v12, %v87_v11  ;;  %v566_v16 = vpack.c.bf16 %v90_v15, %v89_v14  ;;  %v91_v17 = vld [vmem:[#allocation5 + $0x50] sm:$0xff]  ;;  %v92_v18 = vld [vmem:[#allocation5 + $0x58] sm:$0xff]  ;;  %v93_v20 = vld [vmem:[#allocation5 + $0x60] sm:$0xff] }
  0x4e   :  { %556 = vmatprep.subr.bf16.mxu0 %v767_v0  ;;  %v569_v19 = vpack.c.bf16 %v92_v18, %v91_v17  ;;  %v94_v21 = vld [vmem:[#allocation5 + $0x68] sm:$0xff]  ;;  %v95_v23 = vld [vmem:[#allocation5 + $0x70] sm:$0xff]  ;;  %v96_v24 = vld [vmem:[#allocation5 + $0x78] sm:$0xff] }
  0x4f   :  { %v572_v22 = vpack.c.bf16 %v94_v21, %v93_v20  ;;  %v575_v25 = vpack.c.bf16 %v96_v24, %v95_v23  ;;  %v80_v26 = vld [vmem:[#allocation2] sm:$0xff]  ;;  %v181_v27 = vld [vmem:[#allocation7] sm:$0xff]  ;;  %v182_v28 = vld [vmem:[#allocation7 + $0x8] sm:$0xff] }
  0x50   :  { %v578_v29 = vpack.c.bf16 %v182_v28, %v181_v27  ;;  %v183_v30 = vld [vmem:[#allocation7 + $0x10] sm:$0xff]  ;;  %v184_v31 = vld [vmem:[#allocation7 + $0x18] sm:$0xff]  ;;  %v185_v33 = vld [vmem:[#allocation7 + $0x20] sm:$0xff] }
  0x51   :  { %558 = vmatpush3.bf16.msra.mxu0 %v557_v7  ;;  %v581_v32 = vpack.c.bf16 %v184_v31, %v183_v30  ;;  %v186_v34 = vld [vmem:[#allocation7 + $0x28] sm:$0xff]  ;;  %v187_v36 = vld [vmem:[#allocation7 + $0x30] sm:$0xff]  ;;  %v188_v37 = vld [vmem:[#allocation7 + $0x38] sm:$0xff] }
  0x52   :  { %559 = vmatprep.subr.bf16.mxu0 %v767_v0  ;;  %579 = vmatpush3.bf16.msra.mxu1 %v578_v29  ;;  %v584_v35 = vpack.c.bf16 %v186_v34, %v185_v33  ;;  %v587_v38 = vpack.c.bf16 %v188_v37, %v187_v36  ;;  %v189_v39 = vld [vmem:[#allocation7 + $0x40] sm:$0xff]  ;;  %v190_v40 = vld [vmem:[#allocation7 + $0x48] sm:$0xff]  ;;  %v191_v42 = vld [vmem:[#allocation7 + $0x50] sm:$0xff] }
  0x53   :  { %580 = vmatprep.subr.bf16.mxu1 %v767_v0  ;;  %v590_v41 = vpack.c.bf16 %v190_v40, %v189_v39  ;;  %v192_v43 = vld [vmem:[#allocation7 + $0x58] sm:$0xff]  ;;  %v193_v45 = vld [vmem:[#allocation7 + $0x60] sm:$0xff]  ;;  %v194_v46 = vld [vmem:[#allocation7 + $0x68] sm:$0xff] }
  0x54   :  { %v593_v44 = vpack.c.bf16 %v192_v43, %v191_v42  ;;  %v596_v47 = vpack.c.bf16 %v194_v46, %v193_v45  ;;  %v195_v48 = vld [vmem:[#allocation7 + $0x70] sm:$0xff]  ;;  %v196_v49 = vld [vmem:[#allocation7 + $0x78] sm:$0xff]  ;;  %v281_v60 = vld [vmem:[#allocation8] sm:$0xff] }
  0x55   :  { %561 = vmatpush3.bf16.msra.mxu0 %v560_v10  ;;  %v599_v50 = vpack.c.bf16 %v196_v49, %v195_v48  ;;  %v392_v51 = vld [vmem:[%s918_s2] ss:$0 sm:$0xff]  ;;  %v282_v61 = vld [vmem:[#allocation8 + $0x8] sm:$0xff]  ;;  %v283_v63 = vld [vmem:[#allocation8 + $0x10] sm:$0xff] }
  0x56   :  { %562 = vmatprep.subr.bf16.mxu0 %v767_v0  ;;  %582 = vmatpush3.bf16.msra.mxu1 %v581_v32  ;;  %v602_v62 = vpack.c.bf16 %v282_v61, %v281_v60  ;;  %v285_v3 = vld [vmem:[#allocation8 + $0x20] sm:$0xff]  ;;  %v286_v4 = vld [vmem:[#allocation8 + $0x28] sm:$0xff]  ;;  %v287_v6 = vld [vmem:[#allocation8 + $0x30] sm:$0xff] }
  0x57   :  { %583 = vmatprep.subr.bf16.mxu1 %v767_v0  ;;  %v608_v5 = vpack.c.bf16 %v286_v4, %v285_v3  ;;  %v288_v7 = vld [vmem:[#allocation8 + $0x38] sm:$0xff]  ;;  %v289_v9 = vld [vmem:[#allocation8 + $0x40] sm:$0xff]  ;;  %v290_v10 = vld [vmem:[#allocation8 + $0x48] sm:$0xff] }
  0x58   :  { %v611_v8 = vpack.c.bf16 %v288_v7, %v287_v6  ;;  %v614_v11 = vpack.c.bf16 %v290_v10, %v289_v9  ;;  %v291_v12 = vld [vmem:[#allocation8 + $0x50] sm:$0xff]  ;;  %v293_v15 = vld [vmem:[#allocation8 + $0x60] sm:$0xff]  ;;  %v394_v21 = vld [vmem:[%s920_s4] ss:$0 sm:$0xff]  ;;  %s731_s4 = scalar_lea.vmem %s382_s29, 128 }
  0x59   :  { %564 = vmatpush3.bf16.msra.mxu0 %v563_v13  ;;  %v292_v13 = vld [vmem:[#allocation8 + $0x58] sm:$0xff]  ;;  %v295_v18 = vld [vmem:[#allocation8 + $0x70] sm:$0xff]  ;;  %p732_p4 = scmp.ne.s32.totalorder %s382_s29, %s731_s4  ;;  %p737_p6 = scmp.lt.s32.totalorder %s731_s4, %s731_s4 }
  0x5a   :  { %565 = vmatprep.subr.bf16.mxu0 %v767_v0  ;;  %585 = vmatpush3.bf16.msra.mxu1 %v584_v35  ;;  %v617_v14 = vpack.c.bf16 %v292_v13, %v291_v12 }
  0x5b   :  { %586 = vmatprep.subr.bf16.mxu1 %v767_v0  ;;  %p738_p7 = por %p737_p6, %p736_p5 }
  0x5d   :  { %567 = vmatpush3.bf16.msra.mxu0 %v566_v16  ;;  %v294_v16 = vld [vmem:[#allocation8 + $0x68] sm:$0xff]  ;;  %p739_p8 = pnand %p738_p7, %p732_p4 }
  0x5e   :  { %568 = vmatprep.subr.bf16.mxu0 %v767_v0  ;;  %588 = vmatpush3.bf16.msra.mxu1 %v587_v38  ;;  %v620_v17 = vpack.c.bf16 %v294_v16, %v293_v15 }
  0x5f   :  { %589 = vmatprep.subr.bf16.mxu1 %v767_v0 }
  0x61   :  { %570 = vmatpush3.bf16.msra.mxu0 %v569_v19  ;;  %v296_v19 = vld [vmem:[#allocation8 + $0x78] sm:$0xff] }
  0x62   :  { %571 = vmatprep.subr.bf16.mxu0 %v767_v0  ;;  %591 = vmatpush3.bf16.msra.mxu1 %v590_v41  ;;  %v623_v20 = vpack.c.bf16 %v296_v19, %v295_v18 }
  0x63   :  { %592 = vmatprep.subr.bf16.mxu1 %v767_v0 }
  0x65   :  { %573 = vmatpush3.bf16.msra.mxu0 %v572_v22 }
  0x66   :  { %574 = vmatprep.subr.bf16.mxu0 %v767_v0  ;;  %594 = vmatpush3.bf16.msra.mxu1 %v593_v44 }
  0x67   :  { %595 = vmatprep.subr.bf16.mxu1 %v767_v0 }
  0x69   :  { %576 = vmatpush3.bf16.msra.mxu0 %v575_v25 }
  0x6a   :  { %601 = vmatprep.subr.bf16.mxu0 %v767_v0  ;;  %597 = vmatpush3.bf16.msra.mxu1 %v596_v47 }
  0x6b   :  { %598 = vmatprep.subr.bf16.mxu1 %v767_v0 }
  0x6c   :  { %481 = vmatmul.mubr.f32.vlgmr.msra.gmra.mrb[0].mxu0 %v80_v26 }
  0x6d   :  { %550 = vmatprep.mubr.msk.f32.mxu0 %vm768_vm0, %v769_v1  ;;  %603 = vmatpush3.bf16.msra.mxu0 %v602_v62  ;;  %v284_v1 = vld [vmem:[#allocation8 + $0x18] sm:$0xff] }
  0x6e   :  { %600 = vmatpush3.bf16.msra.mxu1 %v599_v50  ;;  %604 = vmatprep.subr.bf16.mxu0 %v767_v0  ;;  %v605_v2 = vpack.c.bf16 %v284_v1, %v283_v63 }
  0x71   :  { %606 = vmatpush3.bf16.msra.mxu0 %v605_v2 }
  0x72   :  { %607 = vmatprep.subr.bf16.mxu0 %v767_v0 }
  0x75   :  { %609 = vmatpush3.bf16.msra.mxu0 %v608_v5 }
  0x76   :  { %610 = vmatprep.subr.bf16.mxu0 %v767_v0 }
  0x79   :  { %612 = vmatpush3.bf16.msra.mxu0 %v611_v8 }
  0x7a   :  { %613 = vmatprep.subr.bf16.mxu0 %v767_v0 }
  0x7d   :  { %615 = vmatpush3.bf16.msra.mxu0 %v614_v11 }
  0x7e   :  { %616 = vmatprep.subr.bf16.mxu0 %v767_v0 }
  0x81   :  { %618 = vmatpush3.bf16.msra.mxu0 %v617_v14 }
  0x82   :  { %619 = vmatprep.subr.bf16.mxu0 %v767_v0 }
  0x85   :  { %621 = vmatpush3.bf16.msra.mxu0 %v620_v17 }
  0x86   :  { %622 = vmatprep.subr.bf16.mxu0 %v767_v0  ;;  %v396_v0 = vld [vmem:[%s922_s6] ss:$0 sm:$0xff] }
  0x89   :  { %624 = vmatpush3.bf16.msra.mxu0 %v623_v20 }
 0x13f   :  { %v170_v52 = vpop.f32.mrb[0].mxu0 }
 0x140   :  { %v171_v53 = vadd.f32 %v392_v51, %v170_v52  ;;  %v482_v54 = vpop.f32.mrb[1].mxu0 }
 0x142   :  { %v393_v55 = vmul.f32 -1.442695, %v171_v53 }
 0x144   :  { %635 = vpow2.f32 %v393_v55 }
 0x14e   :  { %v636_v56 = vpop.eup %635 }
 0x14f   :  { %v177_v57 = vadd.f32 1.0, %v636_v56 }
 0x151   :  { %637 = vrcp.f32 %v177_v57 }
 0x15b   :  { %v638_v58 = vpop.eup %637 }
 0x15c   :  { %v180_v59 = vmul.f32 %v638_v58, %v171_v53 }
 0x15e   :  { %516 = vmatmul.mubr.f32.vlgmr.msra.gmra.mrb[0].mxu1 %v180_v59 }
 0x231   :  { %v270_v22 = vpop.f32.mrb[0].mxu1 }
 0x232   :  { %v271_v23 = vadd.f32 %v394_v21, %v270_v22  ;;  %v517_v24 = vpop.f32.mrb[1].mxu1 }
 0x234   :  { %v395_v25 = vmul.f32 -1.442695, %v271_v23 }
 0x236   :  { %639 = vpow2.f32 %v395_v25 }
 0x240   :  { %v640_v26 = vpop.eup %639 }
 0x241   :  { %v277_v27 = vadd.f32 1.0, %v640_v26 }
 0x243   :  { %641 = vrcp.f32 %v277_v27 }
 0x24d   :  { %v642_v28 = vpop.eup %641 }
 0x24e   :  { %v280_v29 = vmul.f32 %v642_v28, %v271_v23 }
 0x250   :  { %551 = vmatmul.mubr.f32.vlgmr.msra.gmra.mrb[2].mxu0 %v280_v29 }
 0x323   :  { %v370_v30 = vpop.f32.mrb[2].mxu0 }
 0x324   :  { %v371_v31 = vadd.f32 %v396_v0, %v370_v30  ;;  %v552_v32 = vpop.f32.mrb[3].mxu0 }
 0x326   :  { %374 = vst [vmem:[#allocation10] sm:$0xff] %v371_v31 }
 0x327   :  { %742 = shalt.err (!%p739_p8)
}
 0x328   :  { %s743_s9 = scalar_lea.hbm %s923_s7, 128 }
 0x329   :  { %p744_p9 = scmp.ne.s32.totalorder %s923_s7, %s743_s9  ;;  %p747_p10 = scmp.lt.u32.totalorder %s743_s9, %s923_s7 }
 0x32b   :  { %p749_p11 = pnand %p747_p10, %p744_p9 }
 0x32d   :  { %752 = shalt.err (!%p749_p11)
}
 0x32e   :  { %384 = dma.vmem_to_hbm [thread:$0]  %s382_s29, 128, %s923_s7, [#allocation4]  }
 0x32f   :  { %759 = dma.done.wait [#allocation4], 128  }
 0x330   :  { %760 = vsyncadd [#allocation4], 4294967168 }
 0x331   :  { %388 = vsyncpa [#allocation3], 1 }
 0x332   :  { %389 = vsyncpa [#allocation6], 1 }
 0x333   :  { %390 = vsyncpa [#allocation9], 1 }
 0x334   :  { %391 = vsyncpa [#allocation4], 1 }

</bundles_post_ra>
